<compile_context>
chip_gen: v5e
topology: v5e:2x2
jax: 0.10.0
libtpu: 0.0.40
codegen_flags: <defaults>
</compile_context>

<pallas_src>
import functools

import jax
import jax.numpy as jnp
from jax.experimental import pallas as pl
from jax.experimental.pallas import tpu as pltpu


def _round_up(v, m):
    return ((v + m - 1) // m) * m


def _sublane_align(dtype):
    # Second-to-last block dim alignment by element width (f32:8, bf16:16, i8/fp8:32).
    return {4: 8, 2: 16, 1: 32}.get(jnp.dtype(dtype).itemsize, 8)


def _pick_tile(dim, cap, align):
    """Aligned tile <= cap that minimizes padding for ragged dims while keeping
    per-tile reuse as large as possible (divisor-aware)."""
    dim = max(int(dim), 1)
    n_tiles = -(-dim // cap)                      # ceil(dim / cap)
    return min(cap, _round_up(-(-dim // n_tiles), align))


def _dense_kernel_acc(x_ref, w_ref, b_ref, o_ref, acc_ref, *, activation):
    # x_ref: (tm, tk)  w_ref: (tk, tn)  b_ref: (1, tn)  o_ref: (tm, tn)
    # Used when the output dtype is not f32: accumulate in a f32 VMEM scratch.
    k_idx = pl.program_id(2)

    @pl.when(k_idx == 0)
    def _():
        acc_ref[...] = jnp.zeros_like(acc_ref)

    acc_ref[...] += jnp.dot(
        x_ref[...], w_ref[...], preferred_element_type=jnp.float32
    )

    @pl.when(k_idx == pl.num_programs(2) - 1)
    def _():
        acc = acc_ref[...] + b_ref[...]            # bias broadcast (1, tn) over rows
        if activation == "sigmoid":
            acc = jax.nn.sigmoid(acc)              # exp/recip go to the EUP slot
        else:                                      # relu (module default)
            acc = jnp.maximum(acc, 0.0)
        o_ref[...] = acc.astype(o_ref.dtype)


def _dense_kernel_inplace(x_ref, w_ref, b_ref, o_ref, *, activation):
    # f32 output: o_ref stays resident in VMEM across the K axis (its block
    # index is K-invariant), so accumulate into it directly -- no acc scratch,
    # no final tm*tn copy.
    k_idx = pl.program_id(2)

    @pl.when(k_idx == 0)
    def _():
        o_ref[...] = jnp.zeros_like(o_ref)

    o_ref[...] += jnp.dot(
        x_ref[...], w_ref[...], preferred_element_type=jnp.float32
    )

    @pl.when(k_idx == pl.num_programs(2) - 1)
    def _():
        acc = o_ref[...] + b_ref[...]
        if activation == "sigmoid":
            acc = jax.nn.sigmoid(acc)
        else:
            acc = jnp.maximum(acc, 0.0)
        o_ref[...] = acc


def dense_forward(x, weight, bias, activation="relu", compute_dtype=None):
    """Equivalent of Dense.forward.

    x:      (..., input_size)
    weight: (out_size, input_size)  -- PyTorch nn.Linear layout
    bias:   (out_size,)
    compute_dtype: optional (e.g. jnp.bfloat16) -- cast x/weight tiles for the
        MXU while accumulating in f32; output dtype stays x.dtype.
    """
    *lead, k = x.shape
    n = weight.shape[0]
    m = 1
    for d in lead:
        m *= d

    out_dtype = x.dtype
    if m == 0 or n == 0:
        return jnp.zeros((*lead, n), dtype=out_dtype)

    x2d = x.reshape(m, k)
    # One-time transpose to (K, N): MXU contracts (tm,tk)x(tk,tn) with no
    # per-tile weight transpose competing for vector-extended slots.
    wt = jnp.transpose(weight)
    b2d = bias.astype(jnp.float32).reshape(1, n)

    if compute_dtype is not None:
        x2d = x2d.astype(compute_dtype)
        wt = wt.astype(compute_dtype)
    cdt = x2d.dtype
    sub = _sublane_align(cdt)

    # ---- divisor-aware tile sizes ------------------------------------------
    tm = _pick_tile(m, 512, sub)     # sublane-aligned (dtype-aware)
    tn = _pick_tile(n, 1024, 128)    # lane-dense output tiles
    tk = _pick_tile(k, 512, 128)

    mp = _round_up(m, tm)
    npad = _round_up(n, tn)
    kp = _round_up(k, tk)

    # ---- pad operands only where needed (zeros don't change the result) ----
    if (mp, kp) != (m, k):
        x2d = jnp.pad(x2d, ((0, mp - m), (0, kp - k)))
    if (kp, npad) != (k, n):
        wt = jnp.pad(wt, ((0, kp - k), (0, npad - n)))
    if npad != n:
        b2d = jnp.pad(b2d, ((0, 0), (0, npad - n)))

    gm, gn, gk = mp // tm, npad // tn, kp // tk
    grid = (gm, gn, gk)

    use_scratch = jnp.dtype(out_dtype) != jnp.dtype(jnp.float32)
    if use_scratch:
        kernel = functools.partial(_dense_kernel_acc, activation=activation)
        scratch_shapes = [pltpu.VMEM((tm, tn), jnp.float32)]
    else:
        kernel = functools.partial(_dense_kernel_inplace, activation=activation)
        scratch_shapes = []

    in_bytes = jnp.dtype(cdt).itemsize
    out_bytes = jnp.dtype(out_dtype).itemsize
    cost = pl.CostEstimate(
        flops=2 * mp * npad * kp,
        transcendentals=mp * npad if activation == "sigmoid" else 0,
        # x is re-streamed gn times, the weight is re-streamed gm times.
        bytes_accessed=(mp * kp * gn + kp * npad * gm) * in_bytes
        + npad * 4
        + mp * npad * out_bytes,
    )

    out2d = pl.pallas_call(
        kernel,
        out_shape=jax.ShapeDtypeStruct((mp, npad), out_dtype),
        grid_spec=pltpu.PrefetchScalarGridSpec(
            num_scalar_prefetch=0,
            grid=grid,
            in_specs=[
                pl.BlockSpec((tm, tk), lambda i, j, kk: (i, kk)),   # x tile
                pl.BlockSpec((tk, tn), lambda i, j, kk: (kk, j)),   # weight (K, N) tile
                pl.BlockSpec((1, tn), lambda i, j, kk: (0, j)),     # bias tile
            ],
            out_specs=pl.BlockSpec((tm, tn), lambda i, j, kk: (i, j)),
            scratch_shapes=scratch_shapes,
        ),
        compiler_params=pltpu.CompilerParams(
            dimension_semantics=("parallel", "parallel", "arbitrary"),
        ),
        cost_estimate=cost,
    )(x2d, wt, b2d)

    # Strip padding and restore the leading dims.
    return out2d[:m, :n].reshape(*lead, n)


def _ref_forward(x, weight, bias, activation="relu"):
    y = jnp.einsum("...k,nk->...n", x, weight) + bias
    return jax.nn.sigmoid(y) if activation == "sigmoid" else jnp.maximum(y, 0.0)


if __name__ == "__main__":
    key = jax.random.PRNGKey(0)
    kx, kw, kb = jax.random.split(key, 3)

    batch, seq, input_size, out_size = 2, 8, 32, 32

    x = jax.random.normal(kx, (batch, seq, input_size), dtype=jnp.float32)
    # Deterministic parameter init (mimics nn.Linear's uniform(-1/sqrt(fan_in), ...))
    bound = 1.0 / jnp.sqrt(input_size)
    weight = jax.random.uniform(kw, (out_size, input_size), jnp.float32, -bound, bound)
    bias = jax.random.uniform(kb, (out_size,), jnp.float32, -bound, bound)

    out = dense_forward(x, weight, bias, activation="relu")
    out = jax.block_until_ready(out)

    ref = _ref_forward(x, weight, bias, activation="relu")
    assert out.shape == (batch, seq, out_size)
    assert jnp.allclose(out, ref, atol=1e-5, rtol=1e-5)

    # sigmoid branch
    out_sig = jax.block_until_ready(dense_forward(x, weight, bias, activation="sigmoid"))
    ref_sig = _ref_forward(x, weight, bias, activation="sigmoid")
    assert jnp.allclose(out_sig, ref_sig, atol=1e-5, rtol=1e-5)

    # optional bf16 compute path (f32 accumulation, f32 output) -- loose tol
    out_bf = jax.block_until_ready(
        dense_forward(x, weight, bias, activation="relu", compute_dtype=jnp.bfloat16)
    )
    assert jnp.allclose(out_bf, ref, atol=5e-2, rtol=5e-2)

    # larger, ragged multi-tile shape (exercises divisor-aware tiling + K loop)
    kx2, kw2, kb2 = jax.random.split(jax.random.PRNGKey(1), 3)
    M2, K2, N2 = 300, 700, 260   # deliberately non-multiples of the tile sizes
    x2 = jax.random.normal(kx2, (M2, K2), dtype=jnp.float32)
    w2 = jax.random.normal(kw2, (N2, K2), dtype=jnp.float32) * 0.02
    b2 = jax.random.normal(kb2, (N2,), dtype=jnp.float32) * 0.02
    out2 = jax.block_until_ready(dense_forward(x2, w2, b2, activation="relu"))
    ref2 = _ref_forward(x2, w2, b2, activation="relu")
    assert jnp.allclose(out2, ref2, atol=1e-3, rtol=1e-3)

    print("KERNEL_OK")
</pallas_src>

<mosaic_0001>
module attributes {stable_mosaic.version = 11 : i64} {
  func.func @_dense_kernel_inplace(%arg0: i32, %arg1: i32, %arg2: i32, %arg3: memref<16x128xf32, #tpu.memory_space<vmem>>, %arg4: memref<128x128xf32, #tpu.memory_space<vmem>>, %arg5: memref<1x128xf32, #tpu.memory_space<vmem>>, %arg6: memref<16x128xf32, #tpu.memory_space<vmem>>) attributes {dimension_semantics = [#tpu.dimension_semantics<parallel>, #tpu.dimension_semantics<parallel>, #tpu.dimension_semantics<arbitrary>], iteration_bounds = array<i64: 1, 1, 1>, scalar_prefetch = 0 : i64, scratch_operands = 0 : i64, tpu.core_type = #tpu.core_type<tc>, window_params = [{transform_indices = @transform_0, window_bounds = array<i64: 16, 128>}, {transform_indices = @transform_1, window_bounds = array<i64: 128, 128>}, {transform_indices = @transform_2, window_bounds = array<i64: 1, 128>}, {transform_indices = @transform_3, window_bounds = array<i64: 16, 128>}]} {
    %c0_i32 = arith.constant 0 : i32
    %0 = arith.cmpi eq, %arg2, %c0_i32 : i32
    %1 = arith.extui %0 : i1 to i32
    %c0_i32_0 = arith.constant 0 : i32
    %2 = arith.cmpi ne, %1, %c0_i32_0 : i32
    scf.if %2 {
      %cst_10 = arith.constant 0.000000e+00 : f32
      %12 = vector.broadcast %cst_10 : f32 to vector<16x128xf32>
      %c0_11 = arith.constant 0 : index
      %c0_12 = arith.constant 0 : index
      %13 = vector.load %arg6[%c0_11, %c0_12] : memref<16x128xf32, #tpu.memory_space<vmem>>, vector<16x128xf32>
      tpu.vector_store %arg6[%c0_11, %c0_12], %12 {strides = array<i32>} : memref<16x128xf32, #tpu.memory_space<vmem>>, vector<16x128xf32>,
    } else {
    }
    %c0 = arith.constant 0 : index
    %c0_1 = arith.constant 0 : index
    %3 = vector.load %arg6[%c0, %c0_1] : memref<16x128xf32, #tpu.memory_space<vmem>>, vector<16x128xf32>
    %c0_2 = arith.constant 0 : index
    %c0_3 = arith.constant 0 : index
    %4 = vector.load %arg3[%c0_2, %c0_3] : memref<16x128xf32, #tpu.memory_space<vmem>>, vector<16x128xf32>
    %c0_4 = arith.constant 0 : index
    %c0_5 = arith.constant 0 : index
    %5 = vector.load %arg4[%c0_4, %c0_5] : memref<128x128xf32, #tpu.memory_space<vmem>>, vector<128x128xf32>
    %cst = arith.constant dense<0.000000e+00> : vector<16x128xf32>
    %6 = tpu.matmul %4, %5, %cst {dimension_numbers = #tpu.dot_dimension_numbers<[1], [0], [0], [1], [0, 0, 1, 1], [], []>} : vector<16x128xf32>, vector<128x128xf32>, vector<16x128xf32> -> vector<16x128xf32>
    %7 = arith.addf %3, %6 : vector<16x128xf32>
    %c0_6 = arith.constant 0 : index
    %c0_7 = arith.constant 0 : index
    %8 = vector.load %arg6[%c0_6, %c0_7] : memref<16x128xf32, #tpu.memory_space<vmem>>, vector<16x128xf32>
    tpu.vector_store %arg6[%c0_6, %c0_7], %7 {strides = array<i32>} : memref<16x128xf32, #tpu.memory_space<vmem>>, vector<16x128xf32>,
    %c0_i32_8 = arith.constant 0 : i32
    %9 = arith.cmpi eq, %arg2, %c0_i32_8 : i32
    %10 = arith.extui %9 : i1 to i32
    %c0_i32_9 = arith.constant 0 : i32
    %11 = arith.cmpi ne, %10, %c0_i32_9 : i32
    scf.if %11 {
      %c0_10 = arith.constant 0 : index
      %c0_11 = arith.constant 0 : index
      %12 = vector.load %arg6[%c0_10, %c0_11] : memref<16x128xf32, #tpu.memory_space<vmem>>, vector<16x128xf32>
      %c0_12 = arith.constant 0 : index
      %c0_13 = arith.constant 0 : index
      %13 = vector.load %arg5[%c0_12, %c0_13] : memref<1x128xf32, #tpu.memory_space<vmem>>, vector<1x128xf32>
      %14 = vector.broadcast %13 : vector<1x128xf32> to vector<16x128xf32>
      %15 = arith.addf %12, %14 : vector<16x128xf32>
      %cst_14 = arith.constant 0.000000e+00 : f32
      %16 = vector.broadcast %cst_14 : f32 to vector<16x128xf32>
      %17 = arith.maximumf %15, %16 : vector<16x128xf32>
      %c0_15 = arith.constant 0 : index
      %c0_16 = arith.constant 0 : index
      %18 = vector.load %arg6[%c0_15, %c0_16] : memref<16x128xf32, #tpu.memory_space<vmem>>, vector<16x128xf32>
      tpu.vector_store %arg6[%c0_15, %c0_16], %17 {strides = array<i32>} : memref<16x128xf32, #tpu.memory_space<vmem>>, vector<16x128xf32>,
    } else {
    }
    return
  }
  func.func @transform_0(%arg0: i32, %arg1: i32, %arg2: i32) -> (i32, i32) {
    %c0_i32 = arith.constant 0 : i32
    return %arg0, %arg2 : i32, i32
  }
  func.func @transform_1(%arg0: i32, %arg1: i32, %arg2: i32) -> (i32, i32) {
    %c0_i32 = arith.constant 0 : i32
    return %arg2, %arg1 : i32, i32
  }
  func.func @transform_2(%arg0: i32, %arg1: i32, %arg2: i32) -> (i32, i32) {
    %c0_i32 = arith.constant 0 : i32
    %c0_i32_0 = arith.constant 0 : i32
    return %c0_i32, %arg1 : i32, i32
  }
  func.func @transform_3(%arg0: i32, %arg1: i32, %arg2: i32) -> (i32, i32) {
    %c0_i32 = arith.constant 0 : i32
    return %arg0, %arg1 : i32, i32
  }
}

</mosaic_0001>

<bundles_post_ra>
// kernel: tpu_custom_call.1
= control target key start
LH: loop header
LB: loop body
LE: loop exit
PB: predicated region body
PF: predicated region fallthrough
CT: control target
= control target key end

     0   :  { %8 = vsyncpa [#allocation3], 0  ;;  %s282_s0 = inlined_call_operand.hbm [shape: f32[16,128], index: 0, kind: input, shape index: {}]   ;;  %s283_s1 = inlined_call_operand.hbm [shape: f32[128,128], index: 1, kind: input, shape index: {}]   ;;  %s284_s2 = inlined_call_operand.vmem [shape: f32[1,128], index: 2, kind: input, shape index: {}]   ;;  %s285_s3 = inlined_call_operand.hbm [shape: f32[16,128], index: 3, kind: output, shape index: {}]  }
   0x1   :  { %9 = vsyncpa [#allocation6], 0 }
   0x2   :  { %10 = vsyncpa [#allocation4], 0  ;;  %s15_s14 = sshll.u32 %s282_s0, 4  ;;  %s236_s15 = smov [#allocation2]   ;;  %s16_s14 = int_to_ptr.hbm [resolvable:$true] %s15_s14 }
   0x3   :  { %s17_s16 = sshll.u32 %s236_s15, 4  ;;  %s28_s19 = sshll.u32 %s283_s1, 4  ;;  %s18_s16 = int_to_ptr.vmem [resolvable:$true] %s17_s16  ;;  %s29_s19 = int_to_ptr.hbm [resolvable:$true] %s28_s19 }
   0x4   :  { %s237_s20 = smov 128   ;;  %s238_s21 = smov 8  }
   0x5   :  { %23 = dma.hbm_to_vmem [thread:$0]  %s16_s14, 256, %s18_s16, [#allocation3], %s237_s20, %s237_s20, %s238_s21  }
   0x6   :  { %s239_s22 = smov [#allocation5]  }
   0x7   :  { %s30_s23 = sshll.u32 %s239_s22, 4  ;;  %s31_s23 = int_to_ptr.vmem [resolvable:$true] %s30_s23 }
   0x8   :  { %36 = dma.hbm_to_vmem [thread:$0]  %s29_s19, 2048, %s31_s23, [#allocation6], %s237_s20, %s237_s20, %s238_s21  }
   0x9   :  { %230 = dma.done.wait [#allocation3], 256  }
   0xa   :  { %231 = vsyncadd [#allocation3], 4294967040 }
   0xb   :  { %232 = dma.done.wait [#allocation6], 2048  }
   0xc   :  { %233 = vsyncadd [#allocation6], 4294965248  ;;  %v72_v0 = vld [vmem:[#allocation5 + $0x78] sm:$0xff]  ;;  %v71_v1 = vld [vmem:[#allocation5 + $0x70] sm:$0xff]  ;;  %s240_s24 = smov [#allocation7]   ;;  %s121_s28 = sshll.u32 %s285_s3, 4  ;;  %s122_s28 = int_to_ptr.hbm [resolvable:$true] %s121_s28 }
   0xd   :  { %73 = vmatpush.msra.mxu0 %v72_v0  ;;  %135 = vmatpush.msra.mxu1 %v72_v0  ;;  %v70_v2 = vld [vmem:[#allocation5 + $0x68] sm:$0xff]  ;;  %v69_v3 = vld [vmem:[#allocation5 + $0x60] sm:$0xff]  ;;  %v68_v4 = vld [vmem:[#allocation5 + $0x58] sm:$0xff]  ;;  %s119_s25 = sshll.u32 %s240_s24, 4  ;;  %s120_s25 = int_to_ptr.vmem [resolvable:$true] %s119_s25 }
   0xe   :  { %v67_v5 = vld [vmem:[#allocation5 + $0x50] sm:$0xff]  ;;  %v66_v6 = vld [vmem:[#allocation5 + $0x48] sm:$0xff]  ;;  %v65_v7 = vld [vmem:[#allocation5 + $0x40] sm:$0xff] }
   0xf   :  { %74 = vmatpush.msra.mxu0 %v71_v1  ;;  %136 = vmatpush.msra.mxu1 %v71_v1  ;;  %v64_v8 = vld [vmem:[#allocation5 + $0x38] sm:$0xff]  ;;  %v63_v9 = vld [vmem:[#allocation5 + $0x30] sm:$0xff]  ;;  %v62_v10 = vld [vmem:[#allocation5 + $0x28] sm:$0xff] }
  0x10   :  { %v61_v11 = vld [vmem:[#allocation5 + $0x20] sm:$0xff]  ;;  %v60_v12 = vld [vmem:[#allocation5 + $0x18] sm:$0xff]  ;;  %v59_v13 = vld [vmem:[#allocation5 + $0x10] sm:$0xff] }
  0x11   :  { %75 = vmatpush.msra.mxu0 %v70_v2  ;;  %137 = vmatpush.msra.mxu1 %v70_v2  ;;  %v58_v14 = vld [vmem:[#allocation5 + $0x8] sm:$0xff]  ;;  %v57_v15 = vld [vmem:[#allocation5] sm:$0xff]  ;;  %v55_v16 = vld [vmem:[#allocation2] sm:$0xff] }
  0x12   :  { %v56_v17 = vld [vmem:[#allocation2 + $0x8] sm:$0xff]  ;;  %v157_v18 = vld [vmem:[%s284_s2] ss:$0 sm:$0xff] }
  0x13   :  { %76 = vmatpush.msra.mxu0 %v69_v3  ;;  %138 = vmatpush.msra.mxu1 %v69_v3 }
  0x15   :  { %77 = vmatpush.msra.mxu0 %v68_v4  ;;  %139 = vmatpush.msra.mxu1 %v68_v4 }
  0x17   :  { %78 = vmatpush.msra.mxu0 %v67_v5  ;;  %140 = vmatpush.msra.mxu1 %v67_v5 }
  0x19   :  { %79 = vmatpush.msra.mxu0 %v66_v6  ;;  %141 = vmatpush.msra.mxu1 %v66_v6 }
  0x1b   :  { %80 = vmatpush.msra.mxu0 %v65_v7  ;;  %142 = vmatpush.msra.mxu1 %v65_v7 }
  0x1d   :  { %81 = vmatpush.msra.mxu0 %v64_v8  ;;  %143 = vmatpush.msra.mxu1 %v64_v8 }
  0x1f   :  { %82 = vmatpush.msra.mxu0 %v63_v9  ;;  %144 = vmatpush.msra.mxu1 %v63_v9 }
  0x21   :  { %83 = vmatpush.msra.mxu0 %v62_v10  ;;  %145 = vmatpush.msra.mxu1 %v62_v10 }
  0x23   :  { %84 = vmatpush.msra.mxu0 %v61_v11  ;;  %146 = vmatpush.msra.mxu1 %v61_v11 }
  0x25   :  { %85 = vmatpush.msra.mxu0 %v60_v12  ;;  %147 = vmatpush.msra.mxu1 %v60_v12 }
  0x27   :  { %86 = vmatpush.msra.mxu0 %v59_v13  ;;  %148 = vmatpush.msra.mxu1 %v59_v13 }
  0x29   :  { %87 = vmatpush.msra.mxu0 %v58_v14  ;;  %149 = vmatpush.msra.mxu1 %v58_v14 }
  0x2b   :  { %88 = vmatpush.msra.mxu0 %v57_v15  ;;  %150 = vmatpush.msra.mxu1 %v57_v15 }
  0x2c   :  { %89 = vmatmul.f32.vlgmr.msra.gmra.mxu0 %v55_v16  ;;  %92 = vmatmul.f32.vlgmr.msra.gmra.mxu1 %v56_v17 }
  0xa9   :  { %v90_v19 = vpop.f32.mrf.mxu0  ;;  %v93_v20 = vpop.f32.mrf.mxu1 }
  0xaa   :  { %v109_v21 = vadd.f32 %v157_v18, %v90_v19  ;;  %v110_v22 = vadd.f32 %v157_v18, %v93_v20 }
  0xac   :  { %v111_v23 = vmax.f32 %v109_v21, 0.0  ;;  %v112_v24 = vmax.f32 %v110_v22, 0.0 }
  0xae   :  { %113 = vst [vmem:[#allocation7] sm:$0xff] %v111_v23 }
  0xaf   :  { %114 = vst [vmem:[#allocation7 + $0x8] sm:$0xff] %v112_v24 }
  0xb0   :  { %127 = dma.vmem_to_hbm [thread:$0]  %s120_s25, 256, %s122_s28, [#allocation4], %s237_s20, %s237_s20, %s238_s21  }
  0xb1   :  { %234 = dma.done.wait [#allocation4], 256  }
  0xb2   :  { %235 = vsyncadd [#allocation4], 4294967040 }
  0xb3   :  { %132 = vsyncpa [#allocation3], 1 }
  0xb4   :  { %133 = vsyncpa [#allocation6], 1 }
  0xb5   :  { %134 = vsyncpa [#allocation4], 1 }

</bundles_post_ra>
